<compile_context>
chip_gen: v7x
topology: tpu7x:2x2x1
jax: 0.10.0
libtpu: 0.0.40
codegen_flags: <defaults>
</compile_context>

<pallas_src>
import jax
import jax.numpy as jnp
from jax.experimental import pallas as pl
from jax.experimental.pallas import tpu as pltpu

IGNORE_INDEX = -100


def _fused_ce_argmax_kernel(logits_ref, labels_ref, nll_ref, ids_ref):
    """Single pass over a (ROW_TILE, V) logits tile.

    logits_ref : (TM, V)  native dtype  VMEM tile
    labels_ref : (TM, 1)  int32         shifted labels (IGNORE for pad rows)
    nll_ref    : (TM, 1)  f32           masked per-token NLL
    ids_ref    : (TM, 1)  int32         argmax over vocab (generated ids)
    """
    x = logits_ref[...]                                       # (TM, V) native dtype
    labels = labels_ref[...]                                  # (TM, 1) int32
    v = x.shape[-1]

    # (1, V) column index -- broadcasts against (TM, 1); never materialized
    # as a full (TM, V) tile.
    col = jax.lax.broadcasted_iota(jnp.int32, (1, v), 1)

    # Pass 1: row max in native dtype, reused for the LSE shift AND argmax.
    m = jnp.max(x, axis=-1, keepdims=True)                    # (TM, 1)

    # Pass 2 (re-reads x once per chain, all elementwise work fused into the
    # lane reductions):
    #   argmax = first index where x == m  (matches jnp.argmax tie-break)
    ids = jnp.min(jnp.where(x == m, col, v), axis=-1, keepdims=True)

    #   label logit: exactly one non-zero per valid row, so native-dtype sum
    #   is exact; IGNORE rows select nothing -> 0.
    zero = jnp.zeros((), x.dtype)
    sel = jnp.sum(jnp.where(col == labels, x, zero),
                  axis=-1, keepdims=True).astype(jnp.float32)

    #   stable LSE: upcast only (x - m) for the exp; chain fuses into the sum.
    m_f32 = m.astype(jnp.float32)
    p = jnp.exp(x.astype(jnp.float32) - m_f32)
    lse = jnp.log(jnp.sum(p, axis=-1, keepdims=True)) + m_f32

    valid = labels != IGNORE_INDEX                            # (TM, 1) bool
    # jnp.where (not multiply) so NaN/garbage from out-of-bounds tail rows of
    # the last partial block can never leak into the loss sum.
    nll_ref[...] = jnp.where(valid, lse - sel, 0.0)
    ids_ref[...] = ids.astype(jnp.int32)


def _vmem_params():
    """(target logits-block bytes, vmem_limit_bytes) per TPU generation."""
    try:
        kind = jax.devices()[0].device_kind.lower()
    except Exception:  # pragma: no cover
        kind = ""
    if "v7" in kind:
        # 64 MiB VMEM / TC: tight, temp-aware budget.
        return 6 * 1024 * 1024, 48 * 1024 * 1024
    if ("v5" in kind) or ("v6" in kind):
        # 128 MiB VMEM: bigger blocks amortize the ~0.35 us/step overhead.
        return 12 * 1024 * 1024, 80 * 1024 * 1024
    # Unknown generation: conservative (v7x-safe) defaults.
    return 6 * 1024 * 1024, 48 * 1024 * 1024


def _pick_row_tile(n_rows, vocab, dtype, target_bytes):
    """Row tile sized by the REAL dtype, multiple of 16 rows for bf16 (8 for
    f32, 32 for 8-bit), capped so the logits block is ~target_bytes, and kept
    small enough that the grid has >= 2 steps when possible (megacore)."""
    itemsize = jnp.dtype(dtype).itemsize
    mult = max(8, 32 // itemsize)                 # 8 f32, 16 bf16, 32 int8/fp8
    row_bytes = max(vocab * itemsize, 1)

    tile = (target_bytes // row_bytes) // mult * mult
    tile = max(mult, min(4096, tile))

    n_round = -(-n_rows // mult) * mult
    tile = min(tile, n_round)

    # Keep at least 2 grid steps when the problem allows it, so the v7x
    # megacore ("parallel") split actually engages.
    if tile >= 2 * mult and -(-n_rows // tile) < 2:
        half = -(-(n_round // 2) // mult) * mult
        tile = max(mult, half)

    num_blocks = -(-n_rows // tile)
    return int(tile), int(num_blocks)


@jax.jit
def fantasy_team_loss(logits, input_ids):
    """JAX/Pallas equivalent of FantasyTeamLoss.forward.

    Returns (lm_loss, structure_loss, generated_ids).
    """
    B, T, V = logits.shape
    N = B * T

    # Contiguous reshape only -- no copy of the logits tensor.
    flat_logits = logits.reshape(N, V)

    # Shifted labels built on the tiny int32 side:
    #   label[b, t] = input_ids[b, t+1] for t < T-1, else IGNORE (row dropped).
    labels = jnp.concatenate(
        [input_ids[:, 1:].astype(jnp.int32),
         jnp.full((B, 1), IGNORE_INDEX, jnp.int32)], axis=1).reshape(-1)   # (N,)

    target_bytes, vmem_limit = _vmem_params()
    row_tile, num_blocks = _pick_row_tile(N, V, logits.dtype, target_bytes)
    Np = num_blocks * row_tile

    labels_padded = labels
    if Np != N:
        labels_padded = jnp.concatenate(
            [labels, jnp.full((Np - N,), IGNORE_INDEX, jnp.int32)])
    labels_padded = labels_padded.reshape(Np, 1)

    nll, ids = pl.pallas_call(
        _fused_ce_argmax_kernel,
        out_shape=(jax.ShapeDtypeStruct((Np, 1), jnp.float32),
                   jax.ShapeDtypeStruct((Np, 1), jnp.int32)),
        grid_spec=pltpu.PrefetchScalarGridSpec(
            num_scalar_prefetch=0,
            grid=(num_blocks,),
            in_specs=[pl.BlockSpec((row_tile, V), lambda i: (i, 0)),
                      pl.BlockSpec((row_tile, 1), lambda i: (i, 0))],
            out_specs=[pl.BlockSpec((row_tile, 1), lambda i: (i, 0)),
                       pl.BlockSpec((row_tile, 1), lambda i: (i, 0))],
        ),
        compiler_params=pltpu.CompilerParams(
            dimension_semantics=("parallel",),        # megacore split on v7x
            vmem_limit_bytes=vmem_limit),
    )(flat_logits, labels_padded)

    # Tiny (B*T,) reductions + valid mask from the int32 labels (no kernel
    # output needed for the mask).
    valid_cnt = jnp.sum((labels != IGNORE_INDEX).astype(jnp.float32))
    # Matches torch.nn.functional.cross_entropy(reduction='mean', ignore_index):
    # mean over valid tokens; 0/0 = NaN when every label is ignored.
    lm_loss = jnp.sum(nll) / valid_cnt

    generated_ids = ids[:N, 0].reshape(B, T)

    # TODO(synk): tokenizer.batch_decode + regex-based structure_loss are
    # host-side string operations with no Pallas/TPU equivalent; returning 0.
    structure_loss = jnp.zeros((), jnp.int32)

    return lm_loss, structure_loss, generated_ids


def _reference_lm_loss(logits, input_ids):
    """Pure-JAX reference for the cross-entropy part (sanity check)."""
    V = logits.shape[-1]
    sl = logits[:, :-1, :].reshape(-1, V).astype(jnp.float32)
    lbl = input_ids[:, 1:].reshape(-1)
    lse = jax.nn.logsumexp(sl, axis=-1)
    sel = jnp.take_along_axis(sl, lbl[:, None], axis=-1)[:, 0]
    valid = (lbl != IGNORE_INDEX)
    per = jnp.where(valid, lse - sel, 0.0)
    return jnp.sum(per) / jnp.sum(valid.astype(jnp.float32))


if __name__ == "__main__":
    key = jax.random.PRNGKey(0)
    k1, k2 = jax.random.split(key)

    B, T, V = 2, 9, 256  # shifted sequence length = 8
    logits = jax.random.normal(k1, (B, T, V), dtype=jnp.float32)
    input_ids = jax.random.randint(k2, (B, T), 0, V, dtype=jnp.int32)

    lm_loss, structure_loss, generated_ids = fantasy_team_loss(logits, input_ids)
    jax.block_until_ready((lm_loss, structure_loss, generated_ids))

    ref_loss = _reference_lm_loss(logits, input_ids)
    ref_ids = jnp.argmax(logits, axis=-1).astype(jnp.int32)

    assert jnp.allclose(lm_loss, ref_loss, rtol=1e-5, atol=1e-5), (lm_loss, ref_loss)
    assert jnp.array_equal(generated_ids, ref_ids)

    print("KERNEL_OK")
</pallas_src>

<mosaic_0001>
module attributes {stable_mosaic.version = 11 : i64} {
  func.func @_fused_ce_argmax_kernel(%arg0: i32, %arg1: memref<16x256xf32, #tpu.memory_space<vmem>>, %arg2: memref<16x1xi32, #tpu.memory_space<vmem>>, %arg3: memref<16x1xf32, #tpu.memory_space<vmem>>, %arg4: memref<16x1xi32, #tpu.memory_space<vmem>>) attributes {dimension_semantics = [#tpu.dimension_semantics<parallel>], iteration_bounds = array<i64: 2>, scalar_prefetch = 0 : i64, scratch_operands = 0 : i64, tpu.core_type = #tpu.core_type<tc>, window_params = [{transform_indices = @transform_0, window_bounds = array<i64: 16, 256>}, {transform_indices = @transform_1, window_bounds = array<i64: 16, 1>}, {transform_indices = @transform_2, window_bounds = array<i64: 16, 1>}, {transform_indices = @transform_3, window_bounds = array<i64: 16, 1>}]} {
    %c0 = arith.constant 0 : index
    %c0_0 = arith.constant 0 : index
    %0 = vector.load %arg1[%c0, %c0_0] : memref<16x256xf32, #tpu.memory_space<vmem>>, vector<16x256xf32>
    %c0_1 = arith.constant 0 : index
    %c0_2 = arith.constant 0 : index
    %1 = vector.load %arg2[%c0_1, %c0_2] : memref<16x1xi32, #tpu.memory_space<vmem>>, vector<16x1xi32>
    %2 = tpu.iota {dimensions = array<i32: 1>} : vector<1x256xi32>
    %cst = arith.constant dense<0xFF800000> : vector<16xf32>
    %3 = vector.multi_reduction <maximumf>, %0, %cst [1] : vector<16x256xf32> to vector<16xf32>
    %4 = vector.shape_cast %3 : vector<16xf32> to vector<16x1xf32>
    %5 = vector.broadcast %4 : vector<16x1xf32> to vector<16x256xf32>
    %6 = arith.cmpf oeq, %0, %5 : vector<16x256xf32>
    %c256_i32 = arith.constant 256 : i32
    %7 = vector.shape_cast %2 : vector<1x256xi32> to vector<1x256xi32>
    %8 = vector.broadcast %7 : vector<1x256xi32> to vector<16x256xi32>
    %9 = vector.broadcast %c256_i32 : i32 to vector<16x256xi32>
    %10 = arith.select %6, %8, %9 : vector<16x256xi1>, vector<16x256xi32>
    %cst_3 = arith.constant dense<2147483647> : vector<16xi32>
    %11 = vector.multi_reduction <minsi>, %10, %cst_3 [1] : vector<16x256xi32> to vector<16xi32>
    %12 = vector.shape_cast %11 : vector<16xi32> to vector<16x1xi32>
    %13 = vector.broadcast %2 : vector<1x256xi32> to vector<16x256xi32>
    %14 = vector.broadcast %1 : vector<16x1xi32> to vector<16x256xi32>
    %15 = arith.cmpi eq, %13, %14 : vector<16x256xi32>
    %cst_4 = arith.constant 0.000000e+00 : f32
    %16 = vector.broadcast %cst_4 : f32 to vector<16x256xf32>
    %17 = arith.select %15, %0, %16 : vector<16x256xi1>, vector<16x256xf32>
    %cst_5 = arith.constant dense<0.000000e+00> : vector<16xf32>
    %18 = vector.multi_reduction <add>, %17, %cst_5 [1] : vector<16x256xf32> to vector<16xf32>
    %19 = vector.shape_cast %18 : vector<16xf32> to vector<16x1xf32>
    %20 = vector.broadcast %4 : vector<16x1xf32> to vector<16x256xf32>
    %21 = arith.subf %0, %20 : vector<16x256xf32>
    %22 = math.exp %21 : vector<16x256xf32>
    %cst_6 = arith.constant dense<0.000000e+00> : vector<16xf32>
    %23 = vector.multi_reduction <add>, %22, %cst_6 [1] : vector<16x256xf32> to vector<16xf32>
    %24 = vector.shape_cast %23 : vector<16xf32> to vector<16x1xf32>
    %25 = math.log %24 : vector<16x1xf32>
    %26 = arith.addf %25, %4 : vector<16x1xf32>
    %c-100_i32 = arith.constant -100 : i32
    %27 = vector.broadcast %c-100_i32 : i32 to vector<16x1xi32>
    %28 = arith.cmpi ne, %1, %27 : vector<16x1xi32>
    %29 = arith.subf %26, %19 : vector<16x1xf32>
    %cst_7 = arith.constant 0.000000e+00 : f32
    %30 = vector.broadcast %cst_7 : f32 to vector<16x1xf32>
    %31 = arith.select %28, %29, %30 : vector<16x1xi1>, vector<16x1xf32>
    %c0_8 = arith.constant 0 : index
    %c0_9 = arith.constant 0 : index
    %32 = vector.load %arg3[%c0_8, %c0_9] : memref<16x1xf32, #tpu.memory_space<vmem>>, vector<16x1xf32>
    tpu.vector_store %arg3[%c0_8, %c0_9], %31 {strides = array<i32>} : memref<16x1xf32, #tpu.memory_space<vmem>>, vector<16x1xf32>,
    %c0_10 = arith.constant 0 : index
    %c0_11 = arith.constant 0 : index
    %33 = vector.load %arg4[%c0_10, %c0_11] : memref<16x1xi32, #tpu.memory_space<vmem>>, vector<16x1xi32>
    tpu.vector_store %arg4[%c0_10, %c0_11], %12 {strides = array<i32>} : memref<16x1xi32, #tpu.memory_space<vmem>>, vector<16x1xi32>,
    return
  }
  func.func @transform_0(%arg0: i32) -> (i32, i32) {
    %c0_i32 = arith.constant 0 : i32
    %c0_i32_0 = arith.constant 0 : i32
    return %arg0, %c0_i32 : i32, i32
  }
  func.func @transform_1(%arg0: i32) -> (i32, i32) {
    %c0_i32 = arith.constant 0 : i32
    %c0_i32_0 = arith.constant 0 : i32
    return %arg0, %c0_i32 : i32, i32
  }
  func.func @transform_2(%arg0: i32) -> (i32, i32) {
    %c0_i32 = arith.constant 0 : i32
    %c0_i32_0 = arith.constant 0 : i32
    return %arg0, %c0_i32 : i32, i32
  }
  func.func @transform_3(%arg0: i32) -> (i32, i32) {
    %c0_i32 = arith.constant 0 : i32
    %c0_i32_0 = arith.constant 0 : i32
    return %arg0, %c0_i32 : i32, i32
  }
}

</mosaic_0001>

<bundles_post_ra>
// kernel: squeeze.1
= control target key start
LH: loop header
LB: loop body
LE: loop exit
PB: predicated region body
PF: predicated region fallthrough
CT: control target
= control target key end

     0   :  { %s85_s0 = inlined_call_operand.vmem [shape: s32[18], index: 0, kind: input, shape index: {}]   ;;  %s86_s1 = inlined_call_operand.hbm [shape: s32[2,9], index: 1, kind: output, shape index: {}]  }
   0x1   :  { %v5_v0 = vld [vmem:[%s85_s0] sm:$0x1] }
   0x2   :  { %2 = vsyncpa [#allocation1], 0  ;;  %6 = vst [vmem:[#allocation3] sm:$0x1] %v5_v0  ;;  %vm8_vm0 = vcmask 72704   ;;  %s58_s0 = smov 119  }
   0x3   :  { %s59_s8 = smov [#allocation0]  }
   0x4   :  { %s26_s9 = sshll.u32 %s59_s8, 4  ;;  %s27_s9 = int_to_ptr.vmem [resolvable:$true] %s26_s9 }
   0x5   :  { %s34_s10 = scalar_lea.vmem %s27_s9, 32  ;;  %p39_p1 = scmp.lt.s32.totalorder %s27_s9, %s27_s9 }
   0x6   :  { %p35_p0 = scmp.ne.s32.totalorder %s27_s9, %s34_s10  ;;  %p40_p2 = scmp.lt.s32.totalorder %s34_s10, %s34_s10 }
   0x8   :  { %p41_p3 = por %p40_p2, %p39_p1 }
   0x9   :  { %v10_v1 = vld [vmem:[#allocation3] sm:$0x1]  }
   0xa   :  { %v7_v2 = vld [vmem:[#allocation3] sm:$0x1]   ;;  %11 = vrot.lane.b32.xlu0 %v10_v1, %s58_s0  ;;  %p42_p4 = pnand %p41_p3, %p35_p0 }
   0xb   :  { %9 = vst.msk [vmem:[#allocation2] sm:$0x1] %vm8_vm0, %v7_v2  }
  0x7c   :  { %v12_v3 = vpop.permute.xlu0 %11  }
  0x7d   :  { %15 = vst.msk [vmem:[#allocation2 + $0x1] sm:$0x1] %vm8_vm0, %v12_v3  }
  0x84   :  { %v19_v4 = vld [vmem:[#allocation2] sm:$0x3] }
  0x85   :  { %21 = vst [vmem:[#allocation0] sm:$0x3] %v19_v4 }
  0x86   :  { %45 = shalt.err (!%p42_p4)
}
  0x87   :  { %s46_s13 = scalar_lea.hbm %s86_s1, 32 }
  0x88   :  { %p47_p5 = scmp.ne.s32.totalorder %s86_s1, %s46_s13  ;;  %p50_p6 = scmp.lt.u32.totalorder %s46_s13, %s86_s1 }
  0x8a   :  { %p52_p7 = pnand %p50_p6, %p47_p5 }
  0x8c   :  { %55 = shalt.err (!%p52_p7)
}
  0x8d   :  { %29 = dma.vmem_to_hbm [thread:$0]  %s27_s9, 32, %s86_s1, [#allocation1]  }
  0x8e   :  { %56 = dma.done.wait [#allocation1], 32  }
  0x8f   :  { %57 = vsyncadd [#allocation1], 4294967264 }
  0x90   :  { %31 = vsyncpa [#allocation1], 1 }

// kernel: fantasy_team_loss.1
= control target key start
LH: loop header
LB: loop body
LE: loop exit
PB: predicated region body
PF: predicated region fallthrough
CT: control target
= control target key end

     0   :  { %s519_s12 = smov 0   ;;  %s602_s0 = inlined_call_operand.vmem [shape: f32[18,256], index: 0, kind: input, shape index: {}]   ;;  %s603_s1 = inlined_call_operand.vmem [shape: s32[32,1], index: 1, kind: input, shape index: {}]   ;;  %s604_s2 = inlined_call_operand.vmem [shape: f32[32,1], index: 2, kind: output, shape index: {0}]   ;;  %s605_s3 = inlined_call_operand.vmem [shape: s32[32,1], index: 3, kind: output, shape index: {1}]  }
   0x1 LB: > { %s450_s13 = sadd.s32 4294967295, %s496_s12   ;;  %p454_p0 = scmp.ge.s32.totalorder %s496_s12, 1  ;;  %s496_s12 = sphi %s519_s12, %s14_s12  }
   0x2   : > { %p163_p1 = scmp.lt.s32.totalorder %s496_s12, 3 }
   0x4   : > { %p164_p2 = pnand %p454_p0, %p163_p1 }
   0x5   : > { %s455_s14 = sshll.u32 (!%p164_p2), %s450_s13, 1  ;;  %v498_v0 = vmov (!%p164_p2), 0   ;;  %v244_v8 = vlaneseq (!%p164_p2)  ;;  %vm343_vm13 = vcmask (!%p164_p2), 7168  }
   0x6   : > { %167 = sbr.rel (%p164_p2) target bundleno = 471 (0x1d7), region = 28  ;;  %p209_p3 = scmp.lt.s32.totalorder (!%p164_p2), %s455_s14, 2  ;;  %476 = vset.pattern.permute.xlu0 (!%p164_p2), %v498_v0  ;;  %477 = vset.pattern.permute.xlu1 (!%p164_p2), %v498_v0 }
   0x7   : > { %p221_p4 = scmp.lt.s32.totalorder (!%p164_p2), %s455_s14, 3  ;;  %v548_v9 = vand.u32 (!%p164_p2), 127, %v244_v8 }
   0x9   : > { %v551_v10 = vadd.s32 (!%p164_p2), 128, %v548_v9 }
   0xd   : > { %s210_s15 = scalar_select %p209_p3, %s455_s14, 2 }
   0xe   : > { %s607_s14 = smov (!%p221_p4, %s455_s14), 3 }
   0xf   : > { %s466_s16 = sshll.u32 %s210_s15, 4  ;;  %s536_s20 = sshll.u32 %s607_s14, 3 }
  0x10   : > { %s213_s19 = scalar_lea.vmem %s602_s0, %s466_s16  ;;  %s542_s23 = scalar_lea.vmem %s603_s1, %s536_s20 }
  0x11   : > { %v238_v1 = vld [vmem:[%s213_s19] sm:$0xff]  ;;  %v239_v2 = vld [vmem:[%s213_s19 + $0x8] sm:$0xff]  ;;  %v530_v3 = vld [vmem:[%s213_s19 + $0x10] sm:$0xff]  ;;  %s230_s26 = scalar_lea.vmem %s604_s2, %s536_s20  ;;  %s236_s29 = scalar_lea.vmem %s605_s3, %s536_s20 }
  0x12   : > { %v247_v4 = vmax.f32 %v238_v1, %v239_v2  ;;  %v532_v5 = vld [vmem:[%s213_s19 + $0x18] sm:$0xff]  ;;  %v545_v7 = vld [vmem:[%s542_s23] sm:$0xff]  ;;  %v572_v30 = vld [vmem:[%s542_s23 + $0x8] sm:$0xff] }
  0x13   : > { %v250_v6 = vmax.f32 %v530_v3, %v532_v5  ;;  %vm337_vm12 = vcmp.ne.s32.totalorder %v545_v7, 4294967196  ;;  %vm338_vm14 = vcmp.ne.s32.totalorder %v572_v30, 4294967196 }
  0x14   : > { %248 = vmax.xlane.f32.xlu0 %v247_v4 }
  0x18   : > { %251 = vmax.xlane.f32.xlu0 %v250_v6 }
  0x2e   : > { %294 = vperm.xlu0 %476, %v545_v7  }
  0xa1   : > { %v553_v11 = vpop.xlane.xlu0 %248 }
  0xa2   : > { %vm253_vm0 = vcmp.eq.f32.partialorder %v238_v1, %v553_v11  ;;  %vm254_vm1 = vcmp.eq.f32.partialorder %v239_v2, %v553_v11  ;;  %v313_v31 = vsub.f32 %v238_v1, %v553_v11  ;;  %v314_v32 = vsub.f32 %v239_v2, %v553_v11 }
  0xa3   : > { %v257_v12 = vsel %vm253_vm0, %v548_v9, 256  ;;  %v258_v13 = vsel %vm254_vm1, %v551_v10, 256 }
  0xa4   : > { %vm261_vm2 = vcmp.lt.s32.totalorder %v257_v12, %v258_v13  ;;  %v317_v33 = vmul.f32 1.442695, %v313_v31  ;;  %v319_v34 = vmul.f32 1.442695, %v314_v32 }
  0xa5   : > { %v559_v14 = vpop.xlane.xlu0 %251  ;;  %v262_v15 = vsel %vm261_vm2, %v257_v12, %v258_v13 }
  0xa6   : > { %v315_v16 = vsub.f32 %v530_v3, %v559_v14  ;;  %v316_v17 = vsub.f32 %v532_v5, %v559_v14  ;;  %v264_v18 = vshra.s32 %v262_v15, 16  ;;  %vm255_vm3 = vcmp.eq.f32.partialorder %v530_v3, %v559_v14 }
  0xa7   : > { %vm256_vm4 = vcmp.eq.f32.partialorder %v532_v5, %v559_v14  ;;  %v259_v22 = vsel %vm255_vm3, %v548_v9, 256  ;;  %v263_v42 = vand.u32 65535, %v262_v15 }
  0xa8   : > { %v321_v19 = vmul.f32 1.442695, %v315_v16  ;;  %v323_v20 = vmul.f32 1.442695, %v316_v17  ;;  %v266_v21 = vcvt.s32.f32 %v264_v18  ;;  %v260_v23 = vsel %vm256_vm4, %v551_v10, 256 }
  0xa9   : > { %vm277_vm5 = vcmp.lt.s32.totalorder %v259_v22, %v260_v23  ;;  %v265_v44 = vcvt.s32.f32 %v263_v42 }
  0xaa   : > { %478 = vpow2.f32 %v321_v19  ;;  %267 = vmin.xlane.f32.xlu1 %v266_v21  ;;  %v278_v24 = vsel %vm277_vm5, %v259_v22, %v260_v23 }
  0xab   : > { %480 = vpow2.f32 %v323_v20  ;;  %v280_v25 = vshra.s32 %v278_v24, 16  ;;  %v279_v46 = vand.u32 65535, %v278_v24 }
  0xac   : > { %482 = vpow2.f32 %v317_v33 }
  0xad   : > { %v282_v26 = vcvt.s32.f32 %v280_v25  ;;  %484 = vpow2.f32 %v319_v34  ;;  %v295_v35 = vpop.permute.xlu0 %294  ;;  %v281_v48 = vcvt.s32.f32 %v279_v46 }
  0xae   : > { %vm299_vm6 = vcmp.eq.s32.totalorder %v548_v9, %v295_v35  ;;  %vm300_vm7 = vcmp.eq.s32.totalorder %v551_v10, %v295_v35 }
  0xaf   : > { %283 = vmin.xlane.f32.xlu1 %v282_v26  ;;  %v303_v38 = vsel %vm299_vm6, %v238_v1, 0.0  ;;  %v304_v39 = vsel %vm300_vm7, %v239_v2, 0.0 }
  0xb0   : > { %v307_v41 = vadd.f32 %v304_v39, %v303_v38 }
  0xb4   : > { %v479_v27 = vpop.eup %478 }
  0xb5   : > { %v481_v28 = vpop.eup %480 }
  0xb6   : > { %v328_v29 = vadd.f32 %v481_v28, %v479_v27  ;;  %v483_v36 = vpop.eup %482 }
  0xb7   : > { %v485_v37 = vpop.eup %484 }
  0xb8   : > { %329 = vadd.xlane.f32.xlu0 %v328_v29  ;;  %v325_v40 = vadd.f32 %v485_v37, %v483_v36 }
  0xc0   : > { %297 = vperm.xlu1 %477, %v572_v30  }
  0xe4   : > { %326 = vadd.xlane.f32.xlu1 %v325_v40 }
  0xe8   : > { %308 = vadd.xlane.f32.xlu1 %v307_v41 }
 0x137   : > { %v268_v43 = vpop.xlane.xlu1 %267 }
 0x138   : > { %vm269_vm8 = vcmp.eq.f32.partialorder %v266_v21, %v268_v43  ;;  %v274_v62 = vcvt.f32.s32 %v268_v43 }
 0x139   : > { %v270_v45 = vsel %vm269_vm8, %v265_v44, inf }
 0x13a   : > { %271 = vmin.xlane.f32.xlu1 %v270_v45  ;;  %v275_v0 = vshll.u32 %v274_v62, 16 }
 0x13c   : > { %v284_v47 = vpop.xlane.xlu1 %283 }
 0x13d   : > { %vm285_vm9 = vcmp.eq.f32.partialorder %v282_v26, %v284_v47  ;;  %v290_v2 = vcvt.f32.s32 %v284_v47 }
 0x13e   : > { %v286_v49 = vsel %vm285_vm9, %v281_v48, inf }
 0x13f   : > { %287 = vmin.xlane.f32.xlu1 %v286_v49  ;;  %v291_v6 = vshll.u32 %v290_v2, 16 }
 0x140   : > { %v298_v50 = vpop.permute.xlu1 %297 }
 0x141   : > { %vm301_vm10 = vcmp.eq.s32.totalorder %v548_v9, %v298_v50  ;;  %vm302_vm11 = vcmp.eq.s32.totalorder %v551_v10, %v298_v50 }
 0x142   : > { %v305_v51 = vsel %vm301_vm10, %v530_v3, 0.0  ;;  %v306_v52 = vsel %vm302_vm11, %v532_v5, 0.0 }
 0x143   : > { %v310_v53 = vadd.f32 %v306_v52, %v305_v51 }
 0x145   : > { %311 = vadd.xlane.f32.xlu1 %v310_v53  ;;  %v330_v61 = vpop.xlane.xlu0 %329 }
 0x171   : > { %v327_v54 = vpop.xlane.xlu1 %326 }
 0x172   : > { %486 = vlog2.f32 %v327_v54 }
 0x173   : > { %488 = vlog2.f32 %v330_v61 }
 0x175   : > { %v309_v57 = vpop.xlane.xlu1 %308 }
 0x17c   : > { %v487_v55 = vpop.eup %486 }
 0x17d   : > { %v332_v56 = vmul.f32 0.6931472, %v487_v55  ;;  %v489_v4 = vpop.eup %488 }
 0x17e   : > { %v334_v7 = vmul.f32 0.6931472, %v489_v4 }
 0x17f   : > { %v335_v58 = vadd.f32 %v332_v56, %v553_v11 }
 0x180   : > { %v336_v10 = vadd.f32 %v334_v7, %v559_v14 }
 0x181   : > { %v339_v59 = vsub.f32 %v335_v58, %v309_v57 }
 0x183   : > { %v341_v60 = vsel %vm337_vm12, %v339_v59, 0.0 }
 0x184   : > { %344 = vst.msk [vmem:[%s230_s26] sm:$0xff] %vm343_vm13, %v341_v60 }
 0x1c7   : > { %v272_v63 = vpop.xlane.xlu1 %271 }
 0x1c8   : > { %v273_v1 = vcvt.f32.s32 %v272_v63 }
 0x1ca   : > { %v276_v3 = vadd.s32 %v275_v0, %v273_v1 }
 0x1cc   : > { %346 = vst.msk [vmem:[%s236_s29] sm:$0xff] %vm343_vm13, %v276_v3  ;;  %v288_v5 = vpop.xlane.xlu1 %287 }
 0x1cd   : > { %v289_v8 = vcvt.f32.s32 %v288_v5 }
 0x1cf   : > { %v292_v9 = vadd.s32 %v291_v6, %v289_v8 }
 0x1d1   : > { %347 = vst.msk [vmem:[%s236_s29 + $0x8] sm:$0xff] %vm343_vm13, %v292_v9 }
 0x1d2   : > { %v312_v11 = vpop.xlane.xlu1 %311 }
 0x1d3   : > { %v340_v12 = vsub.f32 %v336_v10, %v312_v11 }
 0x1d5   : > { %v342_v13 = vsel %vm338_vm14, %v340_v12, 0.0 }
 0x1d6   : > { %345 = vst.msk [vmem:[%s230_s26 + $0x8] sm:$0xff] %vm343_vm13, %v342_v13 }
 0x1d7 PF: > { %s14_s12 = sadd.s32 1, %s496_s12  }
 0x1d8   : > { %p11_p5 = scmp.ge.s32.totalorder %s14_s12, 4  }
 0x1da   :  { %13 = sbr.rel (!%p11_p5) target bundleno = 1 (0x1), region = 73 }

</bundles_post_ra>
